<compile_context>
chip_gen: v7x
topology: tpu7x:2x2x1
jax: 0.10.0
libtpu: 0.0.40
codegen_flags: <defaults>
</compile_context>

<pallas_src>
import jax
import jax.numpy as jnp
from jax.experimental import pallas as pl
from jax.experimental.pallas import tpu as pltpu


def _transpose_kernel(x_ref, o_ref):
    # x_ref: (1, TS, TH) VMEM tile ; o_ref: (1, TH, TS) VMEM tile.
    o_ref[...] = jnp.transpose(x_ref[...], (0, 2, 1))


def _pick_tile(dim: int, target: int = 512, align: int = 128) -> int:
    """Largest divisor of `dim` that is a multiple of `align` and <= target.

    Falls back to the full extent (always a legal Pallas block extent) when the
    dim is small or has no aligned divisor (ragged dims).
    """
    if dim <= target:
        return dim
    start = target - (target % align)
    for cand in range(start, 0, -align):
        if dim % cand == 0:
            return cand
    return dim  # ragged large dim: full-extent fallback keeps the block legal.


def transpose_pallas(x: jax.Array, dim0: int = 1, dim1: int = 2) -> jax.Array:
    """Equivalent of torch.Tensor.transpose(dim0, dim1) for a 3-D (B, S, H) array.

    Only the (1, 2) swap used by the conformer is implemented as a Pallas kernel.
    """
    # TODO(synk): generalize to arbitrary axis pairs / ranks if ever needed;
    # the conformer only uses Transpose(shape=(1, 2)) on (B, S, H).
    assert x.ndim == 3, "kernel expects a (B, S, H) activation tensor"
    d0 = dim0 % x.ndim
    d1 = dim1 % x.ndim
    assert {d0, d1} == {1, 2}, "conformer uses Transpose(shape=(1, 2))"

    B, S, H = x.shape
    ts = _pick_tile(S)   # S-tile: output last dim -> keep it a multiple of 128
    th = _pick_tile(H)   # H-tile: input  last dim -> keep it a multiple of 128

    grid = (B, S // ts, H // th)
    out_shape = jax.ShapeDtypeStruct((B, H, S), x.dtype)

    return pl.pallas_call(
        _transpose_kernel,
        out_shape=out_shape,
        grid=grid,
        in_specs=[
            pl.BlockSpec((1, ts, th), lambda b, i, j: (b, i, j)),
        ],
        out_specs=pl.BlockSpec((1, th, ts), lambda b, i, j: (b, j, i)),
        compiler_params=pltpu.CompilerParams(
            dimension_semantics=("parallel", "parallel", "parallel"),
            # Headroom for the full-extent fallback path; tiled path uses ~4 MiB.
            # Kept under v7x's 64 MiB physical VMEM.
            vmem_limit_bytes=48 * 1024 * 1024,
        ),
    )(x)


if __name__ == "__main__":
    key = jax.random.PRNGKey(0)
    k0, k1 = jax.random.split(key)

    # Small shape consistent with (batch, seq, hidden) conformer activations.
    B, S, H = 2, 16, 32
    x = jax.random.normal(k0, (B, S, H), dtype=jnp.float32)
    y = transpose_pallas(x, 1, 2)
    jax.block_until_ready(y)
    assert y.shape == (B, H, S)
    assert jnp.array_equal(y, jnp.swapaxes(x, 1, 2))

    # Second check that exercises the tiled (multi-step grid) path.
    B2, S2, H2 = 2, 1024, 256
    x2 = jax.random.normal(k1, (B2, S2, H2), dtype=jnp.float32)
    y2 = transpose_pallas(x2, 1, 2)
    jax.block_until_ready(y2)
    assert y2.shape == (B2, H2, S2)
    assert jnp.array_equal(y2, jnp.swapaxes(x2, 1, 2))

    print("KERNEL_OK")
</pallas_src>

<mosaic_0001>
module attributes {stable_mosaic.version = 11 : i64} {
  func.func @_transpose_kernel(%arg0: i32, %arg1: i32, %arg2: i32, %arg3: memref<1x16x32xf32, #tpu.memory_space<vmem>>, %arg4: memref<1x32x16xf32, #tpu.memory_space<vmem>>) attributes {dimension_semantics = [#tpu.dimension_semantics<parallel>, #tpu.dimension_semantics<parallel>, #tpu.dimension_semantics<parallel>], iteration_bounds = array<i64: 2, 1, 1>, scalar_prefetch = 0 : i64, scratch_operands = 0 : i64, tpu.core_type = #tpu.core_type<tc>, window_params = [{transform_indices = @transform_0, window_bounds = array<i64: 1, 16, 32>}, {transform_indices = @transform_1, window_bounds = array<i64: 1, 32, 16>}]} {
    %c0 = arith.constant 0 : index
    %c0_0 = arith.constant 0 : index
    %c0_1 = arith.constant 0 : index
    %0 = vector.load %arg3[%c0, %c0_0, %c0_1] : memref<1x16x32xf32, #tpu.memory_space<vmem>>, vector<1x16x32xf32>
    %1 = tpu.transpose %0, [0, 2, 1] : vector<1x16x32xf32> -> vector<1x32x16xf32>
    %c0_2 = arith.constant 0 : index
    %c0_3 = arith.constant 0 : index
    %c0_4 = arith.constant 0 : index
    %2 = vector.load %arg4[%c0_2, %c0_3, %c0_4] : memref<1x32x16xf32, #tpu.memory_space<vmem>>, vector<1x32x16xf32>
    tpu.vector_store %arg4[%c0_2, %c0_3, %c0_4], %1 {strides = array<i32>} : memref<1x32x16xf32, #tpu.memory_space<vmem>>, vector<1x32x16xf32>,
    return
  }
  func.func @transform_0(%arg0: i32, %arg1: i32, %arg2: i32) -> (i32, i32, i32) {
    %c0_i32 = arith.constant 0 : i32
    return %arg0, %arg1, %arg2 : i32, i32, i32
  }
  func.func @transform_1(%arg0: i32, %arg1: i32, %arg2: i32) -> (i32, i32, i32) {
    %c0_i32 = arith.constant 0 : i32
    return %arg0, %arg2, %arg1 : i32, i32, i32
  }
}

</mosaic_0001>

<bundles_post_ra>
// kernel: tpu_custom_call.1
= control target key start
LH: loop header
LB: loop body
LE: loop exit
PB: predicated region body
PF: predicated region fallthrough
CT: control target
= control target key end

     0   :  { %6 = vsyncpa [#allocation3], 0  ;;  %s623_s0 = inlined_call_operand.hbm [shape: f32[2,16,32], index: 0, kind: input, shape index: {}]   ;;  %s624_s1 = inlined_call_operand.vmem [shape: f32[2,32,16], index: 1, kind: output, shape index: {}]  }
   0x1   :  { %8 = vsyncpa [#allocation3 + $0x1], 0  ;;  %s499_s6 = smov 0   ;;  %s501_s7 = smov 0  }
   0x2   :  { %s503_s8 = smov 0   ;;  %s505_s9 = smov 0  }
   0x3   :  { %s507_s10 = smov 0   ;;  %s509_s11 = smov 0  }
   0x4 LB: > { %s331_s12 = sadd.s32 4294967295, %s484_s11   ;;  %s33_s13 = sadd.s32 1, %s480_s10  ;;  %s484_s11 = sphi %s509_s11, %s14_s11   ;;  %s480_s10 = sphi %s507_s10, %s632_s10   ;;  %s476_s9 = sphi %s505_s9, %s631_s9   ;;  %s472_s8 = sphi %s503_s8, %s630_s8   ;;  %s468_s7 = sphi %s501_s7, %s629_s7   ;;  %s464_s6 = sphi %s499_s6, %s628_s6  }
   0x5   : > { %p35_p0 = scmp.ge.s32.totalorder %s33_s13, 2  ;;  %s44_s14 = sadd.s32 1, %s472_s8 }
   0x6   : > { %p51_p1 = scmp.ne.s32.totalorder %s472_s8, %s468_s7  ;;  %p52_p2 = scmp.eq.s32.totalorder %s484_s11, 0 }
   0x7   : > { %s634_s13 = smov (%p35_p0, %s33_s13), 0  ;;  %p57_p4 = scmp.ne.s32.totalorder %s468_s7, %s464_s6 }
   0x8   : > { %p535_p3 = por %p52_p2, %p51_p1  ;;  %s37_s16 = ssub.s32 %s480_s10, %s634_s13 }
   0x9   : > { %p58_p5 = scmp.eq.s32.totalorder %s331_s12, 0  ;;  %p42_p6 = scmp.eq.s32.totalorder %s37_s16, 0 }
   0xa   : > { %p352_p8 = scmp.lt.s32.totalorder %s484_s11, 2  ;;  %s111_s19 = sand.u32 1, %s472_s8  }
   0xb   : > { %p542_p7 = por %p58_p5, %p57_p4  ;;  %s344_s20 = sshll.u32 %s480_s10, 8 }
   0xc   : > { %s548_s18 = scalar_select %p42_p6, %s472_s8, %s44_s14  }
   0xd   : > { %s335_s21 = sshll.u32 %s111_s19, 4  ;;  %s555_s24 = scalar_lea.hbm %s623_s0, %s344_s20 }
   0xe   : > { %s115_s25 = scalar_lea.vmem [#allocation2], %s335_s21  ;;  %p559_p9 = pnand %p352_p8, %p535_p3 }
   0xf   : > { %s125_s26 = sshll.u32 %s115_s25, 4  ;;  %s565_s28 = scalar_lea.sflag [#allocation3], %s111_s19  ;;  %s563_s26 = int_to_ptr.vmem [resolvable:$true] %s125_s26 }
  0x10   : > { %s404_s29 = scalar_lea.hbm %s555_s24, 256  ;;  %p406_p11 = pneg %p559_p9 }
  0x11   : > { %p405_p10 = scmp.ne.s32.totalorder %s555_s24, %s404_s29  ;;  %s409_s3 = scalar_lea.hbm %s623_s0, 512 }
  0x12   : > { %p410_p0 = scmp.lt.u32.totalorder %s555_s24, %s623_s0  ;;  %p411_p1 = scmp.lt.u32.totalorder %s409_s3, %s404_s29 }
  0x13   : > { %p407_p12 = pnand %p406_p11, %p405_p10  ;;  %p413_p3 = scmp.lt.u32.totalorder %s404_s29, %s555_s24 }
  0x14   : > { %p412_p2 = por %p411_p1, %p410_p0 }
  0x15   : > { %p408_p13 = pneg %p407_p12 }
  0x16   : > { %p414_p4 = por %p413_p3, %p412_p2 }
  0x18   : > { %p415_p5 = pnand %p414_p4, %p408_p13 }
  0x1a   : > { %418 = shalt.err (!%p415_p5)
}
  0x1b   : > { %s419_s6 = scalar_lea.vmem %s563_s26, 256  ;;  %s486_s12 = smov [#allocation2]  }
  0x1c   : > { %p420_p6 = scmp.ne.s32.totalorder %s563_s26, %s419_s6  ;;  %s424_s14 = sshll.u32 %s486_s12, 4  ;;  %s425_s14 = int_to_ptr.vmem [resolvable:$false] %s424_s14 }
  0x1d   : > { %s426_s15 = scalar_lea.vmem %s425_s14, 512  ;;  %p427_p12 = scmp.lt.s32.totalorder %s563_s26, %s425_s14 }
  0x1e   : > { %p422_p8 = pnand %p420_p6, %p406_p11  ;;  %p428_p0 = scmp.lt.s32.totalorder %s426_s15, %s419_s6 }
  0x20   : > { %p423_p10 = pneg %p422_p8  ;;  %p429_p1 = por %p428_p0, %p427_p12 }
  0x22   : > { %p430_p2 = pnand %p429_p1, %p423_p10 }
  0x24   : > { %433 = shalt.err (!%p430_p2)
}
  0x25   : > { %s487_s16 = smov 128   ;;  %s488_s19 = smov 8  }
  0x26   : > { %351 = dma.hbm_to_vmem [thread:$0]  (!%p559_p9), %s555_s24, 256, %s563_s26, %s565_s28, %s487_s16, %s487_s16, %s488_s19  }
  0x27   : > { %p338_p11 = scmp.ge.s32.totalorder %s484_s11, 1  ;;  %p133_p13 = scmp.lt.s32.totalorder %s484_s11, 3 }
  0x29   : > { %p134_p3 = pnand %p338_p11, %p133_p13 }
  0x2a   : > { %s139_s20 = sand.u32 (!%p134_p3), 1, %s468_s7  }
  0x2b   : > { %137 = sbr.rel (%p134_p3) target bundleno = 194 (0xc2), region = 24  ;;  %s339_s21 = sshll.u32 (!%p134_p3), %s139_s20, 4 }
  0x2c   : > { %s140_s22 = scalar_lea.sflag (!%p134_p3), [#allocation3], %s139_s20  ;;  %s143_s23 = scalar_lea.vmem (!%p134_p3), [#allocation2], %s339_s21 }
  0x32   : > { %459 = dma.done.wait (%p542_p7), %s140_s22, 256  }
  0x33   : > { %461 = vsyncadd (%p542_p7), %s140_s22, 4294967040  ;;  %v183_v0 = vld [vmem:[%s143_s23] sm:$0xff]  ;;  %v184_v1 = vld [vmem:[%s143_s23 + $0x8] sm:$0xff]  ;;  %p171_p9 = scmp.lt.s32.totalorder %s476_s9, 1  ;;  %vm217_vm0 = vcmask 130048  }
  0x34   : > { %185 = vxpose.xlu0.b32.start [1/2] (short) (narrow) %v183_v0, 32 }
  0x35   : > { %s636_s9 = smov (!%p171_p9, %s476_s9), 1 }
  0x36   : > { %s345_s24 = sshll.u32 %s636_s9, 5 }
  0x37   : > { %s181_s27 = scalar_lea.vmem %s624_s1, %s345_s24 }
  0x38   : > { %186 = vxpose.xlu0.b32.end [2/2] (short) (narrow) %v184_v1, 32 }
  0xb4   : > { %v201_v2 = vpop.trf.xlu0 }
  0xb5   : > { %218 = vst.msk [vmem:[%s181_s27] sm:$0xff] %vm217_vm0, %v201_v2 }
  0xb8   : > { %v202_v3 = vpop.trf.xlu0 }
  0xb9   : > { %219 = vst.msk [vmem:[%s181_s27 + $0x8] sm:$0xff] %vm217_vm0, %v202_v3 }
  0xbc   : > { %v203_v4 = vpop.trf.xlu0 }
  0xbd   : > { %220 = vst.msk [vmem:[%s181_s27 + $0x10] sm:$0xff] %vm217_vm0, %v203_v4 }
  0xc0   : > { %v204_v5 = vpop.trf.xlu0 }
  0xc1   : > { %221 = vst.msk [vmem:[%s181_s27 + $0x18] sm:$0xff] %vm217_vm0, %v204_v5 }
  0xc2 PF: > { %s14_s11 = sadd.s32 1, %s484_s11   ;;  %s628_s6 = smov %s468_s7 }
  0xc3   : > { %p11_p7 = scmp.ge.s32.totalorder %s14_s11, 4   ;;  %s629_s7 = smov %s472_s8 }
  0xc4   : > { %s630_s8 = smov %s548_s18  ;;  %s631_s9 = smov %s480_s10 }
  0xc5   : > { %s632_s10 = smov %s634_s13  ;;  %13 = sbr.rel (!%p11_p7) target bundleno = 4 (0x4), region = 64 }
  0xcc   :  { %258 = vsyncpa [#allocation3], 1 }
  0xcd   :  { %260 = vsyncpa [#allocation3 + $0x1], 1 }

</bundles_post_ra>
